<compile_context>
chip_gen: v6e
topology: v6e:2x2x1
jax: 0.10.0
libtpu: 0.0.40
codegen_flags: <defaults>
</compile_context>

<pallas_src>
import jax
import jax.numpy as jnp
from jax.experimental import pallas as pl
from jax.experimental.pallas import tpu as pltpu

LANE = 128        # vreg lane width
SUBLANE = 8       # vreg sublane count (f32)
_SMALL_M = 2048   # at/below this: single no-grid invocation
_M_TILE_MAX = 4096  # max rows per grid step in the tiled path


def _round_up(n, m):
    return ((n + m - 1) // m) * m


def _mlp_kernel(x_ref, w1_ref, b1_ref, w2r_ref, b2_ref, out_ref):
    # Hidden layer on the MXU: (mt, F) @ (F, H_pad), f32 accumulation. x keeps
    # its natural feature width; only the weights carry the lane padding, so
    # z1 / h are lane-dense 128-wide vregs.
    z1 = jnp.dot(x_ref[...], w1_ref[...], preferred_element_type=jnp.float32)
    z1 = z1 + b1_ref[...]                                  # (mt, H_pad) + (1, H_pad)

    # sigmoid via a single EUP tanh: sigmoid(z) = 0.5 * tanh(z / 2) + 0.5
    h = 0.5 * jnp.tanh(0.5 * z1) + 0.5                     # (mt, H_pad)

    # Output layer with n_output == 1: VPU multiply + lane reduction instead of
    # a 1-column MXU matmul. Padded hidden lanes have w2 == 0, so their
    # sigmoid(0) = 0.5 activations contribute nothing.
    y = jnp.sum(h * w2r_ref[...], axis=-1, keepdims=True) + b2_ref[...]
    out_ref[...] = y.astype(out_ref.dtype)


def torch_regressor_forward(x, w1, b1, w2, b2):
    """x: (M, F); w1: (F, H); b1: (H,) or (1, H); w2: (H, 1); b2: scalar-like.
    Returns (M, 1) float32 == predict(sigmoid(hidden(x)))."""
    M, F = x.shape
    H = w1.shape[1]
    n_output = w2.shape[1]
    assert n_output == 1, "kernel specialised to the regressor's scalar output"

    H_pad = _round_up(H, LANE)

    x = x.astype(jnp.float32)
    # Pad ONLY the tiny weights / biases on the hidden axis (done once, outside
    # the kernel). Zeros in padded positions leave the math unchanged.
    w1_pad = jnp.pad(w1.astype(jnp.float32), ((0, 0), (0, H_pad - H)))
    b1_pad = jnp.pad(jnp.reshape(b1, (1, H)).astype(jnp.float32),
                     ((0, 0), (0, H_pad - H)))
    w2_row = jnp.pad(jnp.reshape(w2, (1, H)).astype(jnp.float32),
                     ((0, 0), (0, H_pad - H)))
    b2_2d = jnp.reshape(b2, (1, 1)).astype(jnp.float32)

    if M <= _SMALL_M:
        # Small batch: single invocation, no grid -> no per-step pipeline
        # overhead; all operands whole-array resident in VMEM. Only pad rows to
        # a sublane multiple if actually required (no-op for M % 8 == 0).
        M_pad = _round_up(M, SUBLANE)
        x_in = x if M_pad == M else jnp.pad(x, ((0, M_pad - M), (0, 0)))
        out = pl.pallas_call(
            _mlp_kernel,
            out_shape=jax.ShapeDtypeStruct((M_pad, 1), jnp.float32),
            in_specs=[pl.BlockSpec(memory_space=pltpu.MemorySpace.VMEM)] * 5,
            out_specs=pl.BlockSpec(memory_space=pltpu.MemorySpace.VMEM),
        )(x_in, w1_pad, b1_pad, w2_row, b2_2d)
        return out if M_pad == M else out[:M]

    # Large batch: tile rows of x / out with NO wrapper M-pad. The ragged last
    # tile is handled by Pallas edge-block masking; rows are independent, so
    # unspecified OOB rows of the last input block only produce garbage in rows
    # whose writes are masked (tanh keeps them finite regardless). The tile is
    # capped so the grid has >= 2 steps, letting the "parallel" axis shard
    # across both TensorCores on v7x. Tiny weights use constant index maps and
    # stay VMEM-resident across the grid.
    mt = min(_M_TILE_MAX, _round_up(-(-M // 2), SUBLANE))
    grid = -(-M // mt)  # cdiv
    out = pl.pallas_call(
        _mlp_kernel,
        out_shape=jax.ShapeDtypeStruct((M, 1), jnp.float32),
        grid=(grid,),
        in_specs=[
            pl.BlockSpec((mt, F), lambda i: (i, 0)),       # x at natural F width
            pl.BlockSpec((F, H_pad), lambda i: (0, 0)),    # weights resident
            pl.BlockSpec((1, H_pad), lambda i: (0, 0)),
            pl.BlockSpec((1, H_pad), lambda i: (0, 0)),
            pl.BlockSpec((1, 1), lambda i: (0, 0)),
        ],
        out_specs=pl.BlockSpec((mt, 1), lambda i: (i, 0)),
        compiler_params=pltpu.CompilerParams(
            dimension_semantics=("parallel",)),
    )(x, w1_pad, b1_pad, w2_row, b2_2d)
    return out


def init_params(key, n_feature, n_hidden, n_output):
    """Deterministic init mimicking PyTorch nn.Linear default
    (U(-1/sqrt(fan_in), 1/sqrt(fan_in))). Weights stored as (in, out)."""
    k1, k2, k3, k4 = jax.random.split(key, 4)
    bound1 = 1.0 / jnp.sqrt(jnp.float32(n_feature))
    bound2 = 1.0 / jnp.sqrt(jnp.float32(n_hidden))
    w1 = jax.random.uniform(k1, (n_feature, n_hidden), jnp.float32, -bound1, bound1)
    b1 = jax.random.uniform(k2, (1, n_hidden), jnp.float32, -bound1, bound1)
    w2 = jax.random.uniform(k3, (n_hidden, n_output), jnp.float32, -bound2, bound2)
    b2 = jax.random.uniform(k4, (1, n_output), jnp.float32, -bound2, bound2)
    return w1, b1, w2, b2


if __name__ == "__main__":
    # Small shapes consistent with the module: batch M=8, n_feature=16,
    # n_hidden=10 (as in the script), n_output=1 (scalar regression target).
    M, n_feature, n_hidden, n_output = 8, 16, 10, 1

    key = jax.random.PRNGKey(0)
    kx, kp, kxb = jax.random.split(key, 3)
    x = jax.random.uniform(kx, (M, n_feature), jnp.float32)  # torch.rand analogue
    w1, b1, w2, b2 = init_params(kp, n_feature, n_hidden, n_output)

    # Pure-JAX reference of the same forward pass (exp-form sigmoid).
    def ref_fn(xx):
        return jnp.dot(1.0 / (1.0 + jnp.exp(-(xx @ w1 + b1))), w2) + b2

    # Small-batch (no-grid) path.
    out = jax.block_until_ready(torch_regressor_forward(x, w1, b1, w2, b2))
    assert out.shape == (M, n_output)
    assert jnp.allclose(out, ref_fn(x), atol=1e-5, rtol=1e-5)

    # Tiled (grid) path: >= 2 parallel steps, ragged last tile, no wrapper pad.
    M_big = 2600
    x_big = jax.random.uniform(kxb, (M_big, n_feature), jnp.float32)
    out_big = jax.block_until_ready(torch_regressor_forward(x_big, w1, b1, w2, b2))
    assert out_big.shape == (M_big, n_output)
    assert jnp.allclose(out_big, ref_fn(x_big), atol=1e-5, rtol=1e-5)

    print("KERNEL_OK")
</pallas_src>

<mosaic_0001>
module attributes {stable_mosaic.version = 11 : i64} {
  func.func @_mlp_kernel(%arg0: memref<8x16xf32, #tpu.memory_space<vmem>>, %arg1: memref<16x128xf32, #tpu.memory_space<vmem>>, %arg2: memref<1x128xf32, #tpu.memory_space<vmem>>, %arg3: memref<1x128xf32, #tpu.memory_space<vmem>>, %arg4: memref<1x1xf32, #tpu.memory_space<vmem>>, %arg5: memref<8x1xf32, #tpu.memory_space<vmem>>) attributes {dimension_semantics = [], scalar_prefetch = 0 : i64, scratch_operands = 0 : i64, tpu.core_type = #tpu.core_type<tc>} {
    %c0 = arith.constant 0 : index
    %c0_0 = arith.constant 0 : index
    %0 = vector.load %arg0[%c0, %c0_0] : memref<8x16xf32, #tpu.memory_space<vmem>>, vector<8x16xf32>
    %c0_1 = arith.constant 0 : index
    %c0_2 = arith.constant 0 : index
    %1 = vector.load %arg1[%c0_1, %c0_2] : memref<16x128xf32, #tpu.memory_space<vmem>>, vector<16x128xf32>
    %cst = arith.constant dense<0.000000e+00> : vector<8x128xf32>
    %2 = tpu.matmul %0, %1, %cst {dimension_numbers = #tpu.dot_dimension_numbers<[1], [0], [0], [1], [0, 0, 1, 1], [], []>} : vector<8x16xf32>, vector<16x128xf32>, vector<8x128xf32> -> vector<8x128xf32>
    %c0_3 = arith.constant 0 : index
    %c0_4 = arith.constant 0 : index
    %3 = vector.load %arg2[%c0_3, %c0_4] : memref<1x128xf32, #tpu.memory_space<vmem>>, vector<1x128xf32>
    %4 = vector.broadcast %3 : vector<1x128xf32> to vector<8x128xf32>
    %5 = arith.addf %2, %4 : vector<8x128xf32>
    %cst_5 = arith.constant 5.000000e-01 : f32
    %6 = vector.broadcast %cst_5 : f32 to vector<8x128xf32>
    %7 = arith.mulf %6, %5 : vector<8x128xf32>
    %8 = math.tanh %7 : vector<8x128xf32>
    %cst_6 = arith.constant 5.000000e-01 : f32
    %9 = vector.broadcast %cst_6 : f32 to vector<8x128xf32>
    %10 = arith.mulf %9, %8 : vector<8x128xf32>
    %cst_7 = arith.constant 5.000000e-01 : f32
    %11 = vector.broadcast %cst_7 : f32 to vector<8x128xf32>
    %12 = arith.addf %10, %11 : vector<8x128xf32>
    %c0_8 = arith.constant 0 : index
    %c0_9 = arith.constant 0 : index
    %13 = vector.load %arg3[%c0_8, %c0_9] : memref<1x128xf32, #tpu.memory_space<vmem>>, vector<1x128xf32>
    %14 = vector.broadcast %13 : vector<1x128xf32> to vector<8x128xf32>
    %15 = arith.mulf %12, %14 : vector<8x128xf32>
    %cst_10 = arith.constant dense<0.000000e+00> : vector<8xf32>
    %16 = vector.multi_reduction <add>, %15, %cst_10 [1] : vector<8x128xf32> to vector<8xf32>
    %17 = vector.shape_cast %16 : vector<8xf32> to vector<8x1xf32>
    %c0_11 = arith.constant 0 : index
    %c0_12 = arith.constant 0 : index
    %18 = vector.load %arg4[%c0_11, %c0_12] : memref<1x1xf32, #tpu.memory_space<vmem>>, vector<1x1xf32>
    %19 = vector.broadcast %18 : vector<1x1xf32> to vector<8x1xf32>
    %20 = arith.addf %17, %19 : vector<8x1xf32>
    %c0_13 = arith.constant 0 : index
    %c0_14 = arith.constant 0 : index
    %21 = vector.load %arg5[%c0_13, %c0_14] : memref<8x1xf32, #tpu.memory_space<vmem>>, vector<8x1xf32>
    tpu.vector_store %arg5[%c0_13, %c0_14], %20 {strides = array<i32>} : memref<8x1xf32, #tpu.memory_space<vmem>>, vector<8x1xf32>,
    return
  }
}

</mosaic_0001>

<bundles_post_ra>
// kernel: tpu_custom_call.1
= control target key start
LH: loop header
LB: loop body
LE: loop exit
PB: predicated region body
PF: predicated region fallthrough
CT: control target
= control target key end

     0   :  { %s282_s0 = inlined_call_operand.hbm [shape: f32[8,16], index: 0, kind: input, shape index: {}]   ;;  %s283_s1 = inlined_call_operand.hbm [shape: f32[16,128], index: 1, kind: input, shape index: {}]   ;;  %s284_s2 = inlined_call_operand.vmem [shape: f32[1,128], index: 2, kind: input, shape index: {}]   ;;  %s285_s3 = inlined_call_operand.vmem [shape: f32[1,128], index: 3, kind: input, shape index: {}]   ;;  %s286_s4 = inlined_call_operand.<no memory space> [shape: f32[1,1], index: 4, kind: input, shape index: {}]   ;;  %s287_s5 = inlined_call_operand.vmem [shape: f32[8,1], index: 5, kind: output, shape index: {}]  }
   0x1   :  { %v10_v0 = vstv %s286_s4 }
   0x2   :  { %11 = vst [vmem:[#allocation2] sm:$0x1] %v10_v0 }
   0x3   :  { %12 = vsyncpa [#allocation4], 0 }
   0x4   :  { %13 = vsyncpa [#allocation6], 0  ;;  %s228_s20 = smov [#allocation3]   ;;  %s229_s22 = smov [#allocation5]  }
   0x5   :  { %s20_s21 = sshll.u32 %s228_s20, 4  ;;  %s29_s23 = sshll.u32 %s229_s22, 4  ;;  %s21_s21 = int_to_ptr.vmem [resolvable:$true] %s20_s21  ;;  %s30_s23 = int_to_ptr.vmem [resolvable:$true] %s29_s23 }
   0x6   :  { %s192_s24 = scalar_lea.vmem %s21_s21, 128  ;;  %p197_p1 = scmp.lt.s32.totalorder %s21_s21, %s21_s21 }
   0x7   :  { %p193_p0 = scmp.ne.s32.totalorder %s21_s21, %s192_s24  ;;  %p198_p2 = scmp.lt.s32.totalorder %s192_s24, %s192_s24 }
   0x9   :  { %p199_p3 = por %p198_p2, %p197_p1 }
   0xb   :  { %p200_p4 = pnand %p199_p3, %p193_p0 }
   0xd   :  { %203 = shalt.err (!%p200_p4)
}
   0xe   :  { %23 = dma.hbm_to_vmem [thread:$0]  %s282_s0, 128, %s21_s21, [#allocation4]  }
   0xf   :  { %s212_s4 = scalar_lea.vmem %s30_s23, 256  ;;  %p217_p6 = scmp.lt.s32.totalorder %s30_s23, %s30_s23 }
  0x10   :  { %p213_p5 = scmp.ne.s32.totalorder %s30_s23, %s212_s4  ;;  %p218_p7 = scmp.lt.s32.totalorder %s212_s4, %s212_s4 }
  0x12   :  { %p219_p8 = por %p218_p7, %p217_p6 }
  0x14   :  { %p220_p9 = pnand %p219_p8, %p213_p5 }
  0x16   :  { %223 = shalt.err (!%p220_p9)
}
  0x17   :  { %s230_s27 = smov 128   ;;  %s231_s28 = smov 8  }
  0x18   :  { %35 = dma.hbm_to_vmem [thread:$0]  %s283_s1, 256, %s30_s23, [#allocation6], %s230_s27, %s230_s27, %s231_s28  }
  0x19   :  { %224 = dma.done.wait [#allocation4], 128  }
  0x1a   :  { %225 = vsyncadd [#allocation4], 4294967168 }
  0x1b   :  { %226 = dma.done.wait [#allocation6], 256  }
  0x1c   :  { %227 = vsyncadd [#allocation6], 4294967040  ;;  %v232_v1 = vmov 0.0   ;;  %vm233_vm0 = vmmov 0   ;;  %v50_v2 = vld [vmem:[#allocation5 + $0x8] sm:$0xff]  ;;  %v49_v3 = vld [vmem:[#allocation5] sm:$0xff] }
  0x1d   :  { %169 = vmatprep.subr.mxu0 %v232_v1  ;;  %173 = vmatprep.mubr.msk.f32.mxu0 %vm233_vm0, %v232_v1  ;;  %v48_v4 = vld [vmem:[#allocation3] sm:$0xff]  ;;  %vm58_vm1 = vcmask 130048   ;;  %v162_v5 = vld [vmem:[%s284_s2] ss:$0 sm:$0xff]  ;;  %vm154_vm2 = vcmask 7168  }
  0x1e   :  { %170 = vmatpush3.msra.mxu0 %v50_v2  ;;  %v164_v12 = vld [vmem:[%s285_s3] ss:$0 sm:$0xff] }
  0x1f   :  { %171 = vmatprep.subr.mxu0 %v232_v1  ;;  %v165_v15 = vld [vmem:[#allocation2] ss:$0 sm:$0xff] }
  0x20   :  { %172 = vmatpush3.msra.mxu0 %v49_v3 }
  0x21   :  { %174 = vmatmul.mubr.msk.f32.vlgmr.msra.gmra.mxu0 %vm58_vm1, %v48_v4 }
  0xe1   :  { %v128_v6 = vpop.f32.mrf.mxu0 }
  0xe2   :  { %v129_v7 = vadd.f32 %v162_v5, %v128_v6 }
  0xe3   :  { %v175_v8 = vpop.f32.mrf.mxu0 }
  0xe4   :  { %v132_v9 = vmul.f32 0.5, %v129_v7 }
  0xe6   :  { %182 = vtanh.f32 %v132_v9 }
  0xf3   :  { %v183_v10 = vpop.eup %182 }
  0xf4   :  { %v134_v11 = vmul.f32 0.5, %v183_v10 }
  0xf6   :  { %v135_v13 = vadd.f32 0.5, %v134_v11 }
  0xf8   :  { %v143_v14 = vmul.f32 %v164_v12, %v135_v13 }
  0xfa   :  { %144 = vadd.xlane.f32.xlu0 %v143_v14 }
 0x183   :  { %v145_v16 = vpop.xlane.xlu0 %144 }
 0x184   :  { %v153_v17 = vadd.f32 %v165_v15, %v145_v16 }
 0x186   :  { %155 = vst.msk [vmem:[%s287_s5] sm:$0xff] %vm154_vm2, %v153_v17 }
 0x187   :  { %160 = vsyncpa [#allocation4], 1 }
 0x188   :  { %161 = vsyncpa [#allocation6], 1 }

</bundles_post_ra>
